<compile_context>
chip_gen: v5e
topology: v5e:2x2
jax: 0.10.0
libtpu: 0.0.40
codegen_flags: <defaults>
</compile_context>

<pallas_src>
import functools
import math

import jax
import jax.numpy as jnp
from jax.experimental import pallas as pl
from jax.experimental.pallas import tpu as pltpu

_EPS = 1e-9


def _ru(x, m):
    return ((x + m - 1) // m) * m


# -----------------------------------------------------------------------------
# Pallas kernel: fused (windowed) rfft -> cross spectrum -> PHAT -> lag irfft
# -----------------------------------------------------------------------------
def _gcc_phat_kernel(x_ref, dft_ref, lag_ref, o_ref, *, half):
    # One bf16 MXU pass transforms both mic signals at once:
    #   lanes [0, 2*half)        -> [Re(X_i) | Im(X_i)]
    #   lanes [2*half, 4*half)   -> [Re(X_j) | Im(X_j)]
    spec = jnp.dot(x_ref[...], dft_ref[...], preferred_element_type=jnp.float32)
    spec_i = spec[:, : 2 * half]          # lane-aligned (multiple of 128) slice
    spec_j = spec[:, 2 * half:]

    # Cross power spectrum  C = X_i * conj(X_j)  in the fused lane layout.
    spec_j_sw = pltpu.roll(spec_j, shift=half, axis=1)     # [Im_j | Re_j]
    p1 = spec_i * spec_j                                   # [ReRe | ImIm]
    p2 = spec_i * spec_j_sw                                # [ReIm | ImRe]
    q1 = p1 + pltpu.roll(p1, shift=half, axis=1)           # [ Re(C) |  Re(C)]
    q2 = p2 - pltpu.roll(p2, shift=half, axis=1)           # [-Im(C) |  Im(C)]

    # |C|^2 directly from q1/q2 (Re^2 + Im^2 lands in both halves) — saves a roll.
    mag2 = q1 * q1 + q2 * q2

    lane = jax.lax.broadcasted_iota(jnp.int32, q1.shape, 1)
    cross = jnp.where(lane < half, q1, q2)                 # [ Re(C) |  Im(C)]

    # PHAT weighting C / |C|  (rsqrt runs on the EUP; eps keeps padding at 0).
    cross = cross * jax.lax.rsqrt(mag2 + _EPS * _EPS)

    # irfft at the centered lags: single-pass bf16 MXU, lane-dense bf16 store.
    o_ref[...] = jnp.dot(cross.astype(jnp.bfloat16), lag_ref[...],
                         preferred_element_type=jnp.float32).astype(o_ref.dtype)


# -----------------------------------------------------------------------------
# Glue: framing, constants, wrapper
# -----------------------------------------------------------------------------
def _frame(signal, win, hop):
    # signal: (B, M, S) -> frames (B, M, T, win)  (no padding, like unfold)
    # TODO(synk): framing could be done in-kernel with strided pl.ds reads to
    # halve the HBM traffic of the 50%-overlap framed tensor.
    _, _, s = signal.shape
    n_frames = 1 + (s - win) // hop
    idx = jnp.arange(n_frames)[:, None] * hop + jnp.arange(win)[None, :]
    return signal[:, :, idx]


def _gcc_constants(win, tau_max, half, n_lags_pad):
    n_freq = win // 2 + 1
    n_lags = 2 * tau_max + 1

    n = jnp.arange(win, dtype=jnp.float32)[:, None]
    k = jnp.arange(n_freq, dtype=jnp.float32)[None, :]
    ang = 2.0 * math.pi * n * k / win
    # Periodic Hann (torch.hann_window default) folded into the DFT matrix:
    # (x * h) @ C == x @ (diag(h) C), exact.
    hann = 0.5 - 0.5 * jnp.cos(
        2.0 * math.pi * jnp.arange(win, dtype=jnp.float32) / win)
    blk = jnp.zeros((win, 2 * half), jnp.float32)
    blk = blk.at[:, :n_freq].set(hann[:, None] * jnp.cos(ang))
    blk = blk.at[:, half:half + n_freq].set(-hann[:, None] * jnp.sin(ang))

    # Block-diagonal [blk 0; 0 blk]: transforms the lane-packed xi|xj rows with
    # a single MXU matmul.
    dft = jnp.zeros((2 * win, 4 * half), jnp.float32)
    dft = dft.at[:win, :2 * half].set(blk)
    dft = dft.at[win:, 2 * half:].set(blk)
    dft = dft.astype(jnp.bfloat16)                         # single-pass MXU

    taus = jnp.arange(-tau_max, tau_max + 1, dtype=jnp.float32)[None, :]
    kk = jnp.arange(n_freq, dtype=jnp.float32)[:, None]
    w = jnp.full((n_freq, 1), 2.0, jnp.float32)
    w = w.at[0, 0].set(1.0)                                # DC
    if win % 2 == 0:
        w = w.at[n_freq - 1, 0].set(1.0)                   # Nyquist
    ang_l = 2.0 * math.pi * kk * taus / win
    lag = jnp.zeros((2 * half, n_lags_pad), jnp.float32)
    lag = lag.at[:n_freq, :n_lags].set(w * jnp.cos(ang_l) / win)
    lag = lag.at[half:half + n_freq, :n_lags].set(-w * jnp.sin(ang_l) / win)
    lag = lag.astype(jnp.bfloat16)                         # single-pass MXU
    return dft, lag


def binaural_feature_extractor(x, params):
    win = int(params['win_size'])
    hop = int(win * params['hop_rate'])
    tau_max = int(params['nb_gcc_bins']) // 2
    n_lags = 2 * tau_max + 1
    n_freq = win // 2 + 1
    half = _ru(n_freq, 64)                                 # Im lane offset
    n_lags_pad = _ru(n_lags, 128)                          # lane-dense output

    # Cast to bf16 before framing so the 2x-overlap framed tensor is bf16-only.
    signal = x['signal'].astype(jnp.bfloat16)              # (B, M, S)
    frames = _frame(signal, win, hop)                      # (B, M, T, win) bf16
    B, M, T, _ = frames.shape

    # Binaural -> the single (0,1) pair; enumerate all i<j pairs for generality.
    # TODO(synk): 'mic_pair_sampling_mode' / 'n_mic_pairs' random subsampling of
    # pairs is not replicated (the binaural case has exactly one pair).
    pairs = [(i, j) for i in range(M) for j in range(i + 1, M)]
    P = len(pairs)
    if pairs == [(0, 1)]:                                  # pure slice, no gather
        fi, fj = frames[:, 0:1], frames[:, 1:2]            # (B, 1, T, win)
    else:
        pi = jnp.array([p[0] for p in pairs], dtype=jnp.int32)
        pj = jnp.array([p[1] for p in pairs], dtype=jnp.int32)
        fi, fj = frames[:, pi], frames[:, pj]              # (B, P, T, win)

    # Lane-pack xi|xj per row -> (R, 2*win) bf16.
    x_pack = jnp.concatenate([fi, fj], axis=-1)
    R = B * P * T
    x_pack = x_pack.reshape(R, 2 * win)

    # Big row tiles: amortise per-step overhead; for large R this automatically
    # yields >= 2 grid steps so the "parallel" axis feeds both v7x TensorCores.
    row_tile = min(1024, _ru(R, 16))
    r_pad = _ru(R, row_tile)
    x_pack = jnp.pad(x_pack, ((0, r_pad - R), (0, 0)))

    dft, lag = _gcc_constants(win, tau_max, half, n_lags_pad)

    kernel = functools.partial(_gcc_phat_kernel, half=half)
    out = pl.pallas_call(
        kernel,
        out_shape=jax.ShapeDtypeStruct((r_pad, n_lags_pad), jnp.bfloat16),
        grid_spec=pltpu.PrefetchScalarGridSpec(
            num_scalar_prefetch=0,
            grid=(r_pad // row_tile,),
            in_specs=[
                pl.BlockSpec((row_tile, 2 * win), lambda r: (r, 0)),
                pl.BlockSpec((2 * win, 4 * half), lambda r: (0, 0)),
                pl.BlockSpec((2 * half, n_lags_pad), lambda r: (0, 0)),
            ],
            out_specs=pl.BlockSpec((row_tile, n_lags_pad), lambda r: (r, 0)),
        ),
        compiler_params=pltpu.CompilerParams(
            dimension_semantics=("parallel",)),
    )(x_pack, dft, lag)

    gcc = out[:R, :n_lags].astype(jnp.float32).reshape(B, P, T, n_lags)

    y = dict(x)
    y['signal'] = gcc                                      # (B, P, T, n_lags)
    return y


# -----------------------------------------------------------------------------
# Pure-JAX reference (jnp.fft) for a correctness check
# -----------------------------------------------------------------------------
def _reference(x, params):
    signal = x['signal'].astype(jnp.float32)
    win = params['win_size']
    hop = int(win * params['hop_rate'])
    tau_max = params['nb_gcc_bins'] // 2

    frames = _frame(signal, win, hop)
    B, M, T, _ = frames.shape
    hann = 0.5 - 0.5 * jnp.cos(2.0 * math.pi * jnp.arange(win) / win)
    wframes = frames * hann

    pairs = [(i, j) for i in range(M) for j in range(i + 1, M)]
    X = jnp.fft.rfft(wframes, n=win, axis=-1)
    outs = []
    for (i, j) in pairs:
        c = X[:, i] * jnp.conj(X[:, j])
        c = c / (jnp.abs(c) + _EPS)
        g = jnp.fft.irfft(c, n=win, axis=-1)
        g = jnp.concatenate([g[..., -tau_max:], g[..., :tau_max + 1]], axis=-1)
        outs.append(g)
    return jnp.stack(outs, axis=1)                         # (B, P, T, n_lags)


if __name__ == "__main__":
    params = {
        'mic_pair_sampling_mode': 'all',
        'n_mic_pairs': 1,
        'neural_srp': {'metadata_type': 'none'},
        'win_size': 64,
        'hop_rate': 0.5,
        'nb_gcc_bins': 16,
    }

    key = jax.random.PRNGKey(0)
    signal = jax.random.normal(key, (2, 2, 256), dtype=jnp.float32)
    x = {'signal': signal}

    y = binaural_feature_extractor(x, params)
    gcc = jax.block_until_ready(y['signal'])

    ref = _reference(x, params)
    assert gcc.shape == ref.shape, (gcc.shape, ref.shape)
    err = jnp.abs(gcc - ref)
    # Fully bf16 MXU path (forward DFT, inverse DFT, output store): typical
    # max error ~5e-3..1e-2, mean ~1e-3.
    assert float(jnp.max(err)) < 2.5e-2, float(jnp.max(err))
    assert float(jnp.mean(err)) < 3e-3, float(jnp.mean(err))

    print("KERNEL_OK")
</pallas_src>

<mosaic_0001>
module attributes {stable_mosaic.version = 11 : i64} {
  func.func @_gcc_phat_kernel(%arg0: i32, %arg1: memref<16x128xbf16, #tpu.memory_space<vmem>>, %arg2: memref<128x256xbf16, #tpu.memory_space<vmem>>, %arg3: memref<128x128xbf16, #tpu.memory_space<vmem>>, %arg4: memref<16x128xbf16, #tpu.memory_space<vmem>>) attributes {dimension_semantics = [#tpu.dimension_semantics<parallel>], iteration_bounds = array<i64: 1>, scalar_prefetch = 0 : i64, scratch_operands = 0 : i64, tpu.core_type = #tpu.core_type<tc>, window_params = [{transform_indices = @transform_0, window_bounds = array<i64: 16, 128>}, {pipeline_mode = #tpu.pipeline_mode<synchronous>, transform_indices = @transform_1, window_bounds = array<i64: 128, 256>}, {pipeline_mode = #tpu.pipeline_mode<synchronous>, transform_indices = @transform_2, window_bounds = array<i64: 128, 128>}, {transform_indices = @transform_3, window_bounds = array<i64: 16, 128>}]} {
    %c0 = arith.constant 0 : index
    %c0_0 = arith.constant 0 : index
    %0 = vector.load %arg1[%c0, %c0_0] : memref<16x128xbf16, #tpu.memory_space<vmem>>, vector<16x128xbf16>
    %c0_1 = arith.constant 0 : index
    %c0_2 = arith.constant 0 : index
    %1 = vector.load %arg2[%c0_1, %c0_2] : memref<128x256xbf16, #tpu.memory_space<vmem>>, vector<128x256xbf16>
    %cst = arith.constant dense<0.000000e+00> : vector<16x256xf32>
    %2 = tpu.matmul %0, %1, %cst {dimension_numbers = #tpu.dot_dimension_numbers<[1], [0], [0], [1], [0, 0, 1, 1], [], []>} : vector<16x128xbf16>, vector<128x256xbf16>, vector<16x256xf32> -> vector<16x256xf32>
    %3 = vector.extract_strided_slice %2 {offsets = [0, 0], sizes = [16, 128], strides = [1, 1]} : vector<16x256xf32> to vector<16x128xf32>
    %4 = vector.extract_strided_slice %2 {offsets = [0, 128], sizes = [16, 128], strides = [1, 1]} : vector<16x256xf32> to vector<16x128xf32>
    %c64_i32 = arith.constant 64 : i32
    %5 = tpu.dynamic_rotate %4 by %c64_i32 dim 1 : vector<16x128xf32>, i32 -> vector<16x128xf32>
    %6 = arith.mulf %3, %4 : vector<16x128xf32>
    %7 = arith.mulf %3, %5 : vector<16x128xf32>
    %c64_i32_3 = arith.constant 64 : i32
    %8 = tpu.dynamic_rotate %6 by %c64_i32_3 dim 1 : vector<16x128xf32>, i32 -> vector<16x128xf32>
    %9 = arith.addf %6, %8 : vector<16x128xf32>
    %c64_i32_4 = arith.constant 64 : i32
    %10 = tpu.dynamic_rotate %7 by %c64_i32_4 dim 1 : vector<16x128xf32>, i32 -> vector<16x128xf32>
    %11 = arith.subf %7, %10 : vector<16x128xf32>
    %12 = arith.mulf %9, %9 : vector<16x128xf32>
    %13 = arith.mulf %11, %11 : vector<16x128xf32>
    %14 = arith.addf %12, %13 : vector<16x128xf32>
    %15 = tpu.iota {dimensions = array<i32: 1>} : vector<16x128xi32>
    %c64_i32_5 = arith.constant 64 : i32
    %16 = vector.broadcast %c64_i32_5 : i32 to vector<16x128xi32>
    %17 = arith.cmpi slt, %15, %16 : vector<16x128xi32>
    %18 = arith.select %17, %9, %11 : vector<16x128xi1>, vector<16x128xf32>
    %cst_6 = arith.constant 1.000000e-18 : f32
    %19 = vector.broadcast %cst_6 : f32 to vector<16x128xf32>
    %20 = arith.addf %14, %19 : vector<16x128xf32>
    %21 = math.rsqrt %20 : vector<16x128xf32>
    %22 = arith.mulf %18, %21 : vector<16x128xf32>
    %23 = arith.truncf %22 : vector<16x128xf32> to vector<16x128xbf16>
    %c0_7 = arith.constant 0 : index
    %c0_8 = arith.constant 0 : index
    %24 = vector.load %arg3[%c0_7, %c0_8] : memref<128x128xbf16, #tpu.memory_space<vmem>>, vector<128x128xbf16>
    %cst_9 = arith.constant dense<0.000000e+00> : vector<16x128xf32>
    %25 = tpu.matmul %23, %24, %cst_9 {dimension_numbers = #tpu.dot_dimension_numbers<[1], [0], [0], [1], [0, 0, 1, 1], [], []>} : vector<16x128xbf16>, vector<128x128xbf16>, vector<16x128xf32> -> vector<16x128xf32>
    %26 = arith.truncf %25 : vector<16x128xf32> to vector<16x128xbf16>
    %c0_10 = arith.constant 0 : index
    %c0_11 = arith.constant 0 : index
    %27 = vector.load %arg4[%c0_10, %c0_11] : memref<16x128xbf16, #tpu.memory_space<vmem>>, vector<16x128xbf16>
    tpu.vector_store %arg4[%c0_10, %c0_11], %26 {strides = array<i32>} : memref<16x128xbf16, #tpu.memory_space<vmem>>, vector<16x128xbf16>,
    return
  }
  func.func @transform_0(%arg0: i32) -> (i32, i32) {
    %c0_i32 = arith.constant 0 : i32
    %c0_i32_0 = arith.constant 0 : i32
    return %arg0, %c0_i32 : i32, i32
  }
  func.func @transform_1(%arg0: i32) -> (i32, i32) {
    %c0_i32 = arith.constant 0 : i32
    %c0_i32_0 = arith.constant 0 : i32
    %c0_i32_1 = arith.constant 0 : i32
    return %c0_i32, %c0_i32_0 : i32, i32
  }
  func.func @transform_2(%arg0: i32) -> (i32, i32) {
    %c0_i32 = arith.constant 0 : i32
    %c0_i32_0 = arith.constant 0 : i32
    %c0_i32_1 = arith.constant 0 : i32
    return %c0_i32, %c0_i32_0 : i32, i32
  }
  func.func @transform_3(%arg0: i32) -> (i32, i32) {
    %c0_i32 = arith.constant 0 : i32
    %c0_i32_0 = arith.constant 0 : i32
    return %arg0, %c0_i32 : i32, i32
  }
}

</mosaic_0001>

<bundles_post_ra>
// kernel: tpu_custom_call.1
= control target key start
LH: loop header
LB: loop body
LE: loop exit
PB: predicated region body
PF: predicated region fallthrough
CT: control target
= control target key end

     0   :  { %8 = vsyncpa [#allocation3], 0  ;;  %s651_s0 = inlined_call_operand.hbm [shape: bf16[16,128], index: 0, kind: input, shape index: {}]   ;;  %s652_s1 = inlined_call_operand.hbm [shape: bf16[128,256], index: 1, kind: input, shape index: {}]   ;;  %s653_s2 = inlined_call_operand.hbm [shape: bf16[128,128], index: 2, kind: input, shape index: {}]   ;;  %s654_s3 = inlined_call_operand.hbm [shape: bf16[16,128], index: 3, kind: output, shape index: {}]  }
   0x1   :  { %9 = vsyncpa [#allocation6], 0  ;;  %s28_s14 = sshll.u32 %s652_s1, 4  ;;  %s29_s14 = int_to_ptr.hbm [resolvable:$true] %s28_s14 }
   0x2   :  { %10 = vsyncpa [#allocation4], 0  ;;  %s596_s15 = smov [#allocation5]   ;;  %s15_s19 = sshll.u32 %s651_s0, 4  ;;  %s16_s19 = int_to_ptr.hbm [resolvable:$true] %s15_s19 }
   0x3   :  { %s30_s16 = sshll.u32 %s596_s15, 4  ;;  %s597_s20 = smov 128   ;;  %s31_s16 = int_to_ptr.vmem [resolvable:$true] %s30_s16 }
   0x4   :  { %s598_s21 = smov 8   ;;  %s599_s22 = smov [#allocation2]  }
   0x5   :  { %36 = dma.hbm_to_vmem [thread:$0]  %s29_s14, 2048, %s31_s16, [#allocation6], %s597_s20, %s597_s20, %s598_s21  }
   0x6   :  { %s17_s23 = sshll.u32 %s599_s22, 4  ;;  %s600_s24 = smov 64   ;;  %s18_s23 = int_to_ptr.vmem [resolvable:$true] %s17_s23 }
   0x7   :  { %s601_s25 = smov 4   ;;  %s41_s27 = sshll.u32 %s653_s2, 4  ;;  %s42_s27 = int_to_ptr.hbm [resolvable:$true] %s41_s27 }
   0x8   :  { %23 = dma.hbm_to_vmem [thread:$0]  %s16_s19, 128, %s18_s23, [#allocation3], %s600_s24, %s600_s24, %s601_s25  }
   0x9   :  { %s602_s28 = smov [#allocation7]  }
   0xa   :  { %s43_s0 = sshll.u32 %s602_s28, 4  ;;  %s44_s0 = int_to_ptr.vmem [resolvable:$true] %s43_s0 }
   0xb   :  { %49 = dma.hbm_to_vmem [thread:$0]  %s42_s27, 1024, %s44_s0, [#allocation6], %s600_s24, %s600_s24, %s601_s25  }
   0xc   :  { %590 = dma.done.wait [#allocation3], 128  }
   0xd   :  { %591 = vsyncadd [#allocation3], 4294967168 }
   0xe   :  { %592 = dma.done.wait [#allocation6], 3072  }
   0xf   :  { %593 = vsyncadd [#allocation6], 4294964224  ;;  %v414_v0 = vld [vmem:[#allocation5 + $0x70] sm:$0xf]  ;;  %v468_v1 = vld [vmem:[#allocation5 + $0x74] sm:$0xf0] }
  0x10   :  { %v467_v2 = vld [vmem:[#allocation5 + $0x74] sm:$0xf]  ;;  %v415_v3 = vor.u32 %v468_v1, %v414_v0  ;;  %v416_v4 = vld [vmem:[#allocation5 + $0x78] sm:$0xf0]  ;;  %v406_v5 = vld [vmem:[#allocation5 + $0x60] sm:$0xf] }
  0x11   :  { %v466_v6 = vld [vmem:[#allocation5 + $0x64] sm:$0xf0]  ;;  %v419_v7 = vor.u32 %v467_v2, %v416_v4  ;;  %v465_v8 = vld [vmem:[#allocation5 + $0x64] sm:$0xf]  ;;  %v408_v9 = vld [vmem:[#allocation5 + $0x68] sm:$0xf0] }
  0x12   :  { %166 = vmatpush.bf16.msra.mxu0 %v415_v3  ;;  %v407_v10 = vor.u32 %v466_v6, %v406_v5  ;;  %v411_v11 = vor.u32 %v465_v8, %v408_v9  ;;  %v398_v12 = vld [vmem:[#allocation5 + $0x50] sm:$0xf]  ;;  %v464_v13 = vld [vmem:[#allocation5 + $0x54] sm:$0xf0]  ;;  %v463_v14 = vld [vmem:[#allocation5 + $0x54] sm:$0xf] }
  0x13   :  { %180 = vmatpush.bf16.msra.mxu1 %v419_v7  ;;  %v400_v15 = vld [vmem:[#allocation5 + $0x58] sm:$0xf0]  ;;  %v399_v16 = vor.u32 %v464_v13, %v398_v12  ;;  %v390_v18 = vld [vmem:[#allocation5 + $0x40] sm:$0xf]  ;;  %v462_v19 = vld [vmem:[#allocation5 + $0x44] sm:$0xf0] }
  0x14   :  { %v403_v17 = vor.u32 %v463_v14, %v400_v15  ;;  %v461_v20 = vld [vmem:[#allocation5 + $0x44] sm:$0xf]  ;;  %v392_v21 = vld [vmem:[#allocation5 + $0x48] sm:$0xf0]  ;;  %v391_v22 = vor.u32 %v462_v19, %v390_v18  ;;  %v382_v24 = vld [vmem:[#allocation5 + $0x30] sm:$0xf] }
  0x15   :  { %v395_v23 = vor.u32 %v461_v20, %v392_v21  ;;  %v460_v25 = vld [vmem:[#allocation5 + $0x34] sm:$0xf0]  ;;  %v459_v26 = vld [vmem:[#allocation5 + $0x34] sm:$0xf]  ;;  %v384_v27 = vld [vmem:[#allocation5 + $0x38] sm:$0xf0] }
  0x16   :  { %167 = vmatpush.bf16.msra.mxu0 %v407_v10  ;;  %v383_v28 = vor.u32 %v460_v25, %v382_v24  ;;  %v387_v29 = vor.u32 %v459_v26, %v384_v27  ;;  %v374_v30 = vld [vmem:[#allocation5 + $0x20] sm:$0xf]  ;;  %v458_v31 = vld [vmem:[#allocation5 + $0x24] sm:$0xf0]  ;;  %v457_v32 = vld [vmem:[#allocation5 + $0x24] sm:$0xf]  ;;  %v220_v24 = vlaneseq }
  0x17   :  { %181 = vmatpush.bf16.msra.mxu1 %v411_v11  ;;  %v376_v33 = vld [vmem:[#allocation5 + $0x28] sm:$0xf0]  ;;  %v375_v34 = vor.u32 %v458_v31, %v374_v30  ;;  %v366_v36 = vld [vmem:[#allocation5 + $0x10] sm:$0xf]  ;;  %v456_v37 = vld [vmem:[#allocation5 + $0x14] sm:$0xf0] }
  0x18   :  { %v379_v35 = vor.u32 %v457_v32, %v376_v33  ;;  %v455_v38 = vld [vmem:[#allocation5 + $0x14] sm:$0xf]  ;;  %v368_v39 = vld [vmem:[#allocation5 + $0x18] sm:$0xf0]  ;;  %v367_v40 = vor.u32 %v456_v37, %v366_v36  ;;  %v358_v42 = vld [vmem:[#allocation5] sm:$0xf] }
  0x19   :  { %v371_v41 = vor.u32 %v455_v38, %v368_v39  ;;  %v454_v43 = vld [vmem:[#allocation5 + $0x4] sm:$0xf0]  ;;  %v453_v44 = vld [vmem:[#allocation5 + $0x4] sm:$0xf]  ;;  %v360_v45 = vld [vmem:[#allocation5 + $0x8] sm:$0xf0] }
  0x1a   :  { %168 = vmatpush.bf16.msra.mxu0 %v399_v16  ;;  %v359_v46 = vor.u32 %v454_v43, %v358_v42  ;;  %v363_v47 = vor.u32 %v453_v44, %v360_v45  ;;  %v452_v48 = vld [vmem:[#allocation2] sm:$0xff]  ;;  %v475_v60 = vld [vmem:[#allocation7 + $0x30] sm:$0xff]  ;;  %v474_v61 = vld [vmem:[#allocation7 + $0x28] sm:$0xff]  ;;  %s603_s2 = smov [#allocation8]   ;;  %s338_s5 = sshll.u32 %s654_s3, 4  ;;  %s339_s5 = int_to_ptr.hbm [resolvable:$true] %s338_s5 }
  0x1b   :  { %182 = vmatpush.bf16.msra.mxu1 %v403_v17  ;;  %v476_v59 = vld [vmem:[#allocation7 + $0x38] sm:$0xff]  ;;  %v473_v62 = vld [vmem:[#allocation7 + $0x20] sm:$0xff]  ;;  %v471_v1 = vld [vmem:[#allocation7 + $0x10] sm:$0xff]  ;;  %s336_s29 = sshll.u32 %s603_s2, 4  ;;  %s337_s29 = int_to_ptr.vmem [resolvable:$true] %s336_s29 }
  0x1c   :  { %314 = vmatpush.bf16.msra.mxu2 %v476_v59  ;;  %v472_v63 = vld [vmem:[#allocation7 + $0x18] sm:$0xff]  ;;  %v470_v2 = vld [vmem:[#allocation7 + $0x8] sm:$0xff]  ;;  %v469_v5 = vld [vmem:[#allocation7] sm:$0xff] }
  0x1e   :  { %169 = vmatpush.bf16.msra.mxu0 %v391_v22 }
  0x1f   :  { %183 = vmatpush.bf16.msra.mxu1 %v395_v23 }
  0x20   :  { %315 = vmatpush.bf16.msra.mxu2 %v475_v60 }
  0x22   :  { %170 = vmatpush.bf16.msra.mxu0 %v383_v28  ;;  %v221_v28 = vand.u32 127, %v220_v24 }
  0x23   :  { %184 = vmatpush.bf16.msra.mxu1 %v387_v29 }
  0x24   :  { %316 = vmatpush.bf16.msra.mxu2 %v474_v61  ;;  %vm222_vm3 = vcmp.lt.s32.totalorder %v221_v28, 64 }
  0x26   :  { %171 = vmatpush.bf16.msra.mxu0 %v375_v34 }
  0x27   :  { %185 = vmatpush.bf16.msra.mxu1 %v379_v35 }
  0x28   :  { %317 = vmatpush.bf16.msra.mxu2 %v473_v62 }
  0x2a   :  { %172 = vmatpush.bf16.msra.mxu0 %v367_v40 }
  0x2b   :  { %186 = vmatpush.bf16.msra.mxu1 %v371_v41 }
  0x2c   :  { %318 = vmatpush.bf16.msra.mxu2 %v472_v63 }
  0x2e   :  { %173 = vmatpush.bf16.msra.mxu0 %v359_v46 }
  0x2f   :  { %187 = vmatpush.bf16.msra.mxu1 %v363_v47 }
  0x30   :  { %319 = vmatpush.bf16.msra.mxu2 %v471_v1 }
  0x31   :  { %174 = vmatmul.bf16.vlgmr.msra.gmra.mxu0 %v452_v48 }
  0x32   :  { %188 = vmatmul.bf16.vlgmr.msra.gmra.mxu1 %v452_v48 }
  0x34   :  { %320 = vmatpush.bf16.msra.mxu2 %v470_v2 }
  0x38   :  { %321 = vmatpush.bf16.msra.mxu2 %v469_v5 }
  0xae   :  { %v175_v49 = vpop.f32.mrf.mxu0 }
  0xaf   :  { %v189_v50 = vpop.f32.mrf.mxu1 }
  0xb0   :  { %194 = vrot.lane.b32.xlu0 %v189_v50, %s600_s24  ;;  %v198_v51 = vmul.f32 %v189_v50, %v175_v49 }
  0xb2   :  { %202 = vrot.lane.b32.xlu1 %v198_v51, %s600_s24 }
  0xb6   :  { %v177_v52 = vpop.f32.mrf.mxu0 }
  0xb7   :  { %v191_v53 = vpop.f32.mrf.mxu1 }
  0xb8   :  { %v199_v54 = vmul.f32 %v191_v53, %v177_v52  ;;  %196 = vrot.lane.b32.xlu0 %v191_v53, %s600_s24 }
  0xba   :  { %204 = vrot.lane.b32.xlu1 %v199_v54, %s600_s24 }
 0x122   :  { %v195_v55 = vpop.permute.xlu0 %194 }
 0x123   :  { %v200_v56 = vmul.f32 %v195_v55, %v175_v49 }
 0x124   :  { %v203_v0 = vpop.permute.xlu1 %202 }
 0x125   :  { %208 = vrot.lane.b32.xlu2 %v200_v56, %s600_s24  ;;  %v206_v3 = vadd.f32 %v203_v0, %v198_v51 }
 0x127   :  { %v214_v7 = vmul.f32 %v206_v3, %v206_v3 }
 0x12a   :  { %v197_v57 = vpop.permute.xlu0 %196 }
 0x12b   :  { %v201_v58 = vmul.f32 %v197_v57, %v177_v52 }
 0x12c   :  { %v205_v9 = vpop.permute.xlu1 %204 }
 0x12d   :  { %210 = vrot.lane.b32.xlu2 %v201_v58, %s600_s24  ;;  %v207_v11 = vadd.f32 %v205_v9, %v199_v54 }
 0x12f   :  { %v215_v15 = vmul.f32 %v207_v11, %v207_v11 }
 0x17f   :  { %v209_v4 = vpop.permute.xlu2 %208 }
 0x180   :  { %v212_v6 = vsub.f32 %v200_v56, %v209_v4 }
 0x182   :  { %v216_v8 = vmul.f32 %v212_v6, %v212_v6  ;;  %v223_v34 = vsel %vm222_vm3, %v206_v3, %v212_v6 }
 0x184   :  { %v218_v10 = vadd.f32 %v216_v8, %v214_v7 }
 0x186   :  { %v225_v12 = vadd.f32 1e-18, %v218_v10 }
 0x187   :  { %v211_v13 = vpop.permute.xlu2 %210 }
 0x188   :  { %490 = vrsqrt.f32 %v225_v12  ;;  %v213_v14 = vsub.f32 %v201_v58, %v211_v13  ;;  %vm233_vm1 = vweird.f32 %v225_v12 }
 0x18a   :  { %v217_v16 = vmul.f32 %v213_v14, %v213_v14  ;;  %v224_v35 = vsel %vm222_vm3, %v207_v11, %v213_v14 }
 0x18c   :  { %v219_v17 = vadd.f32 %v217_v16, %v215_v15 }
 0x18e   :  { %v491_v18 = vpop.eup %490  ;;  %v226_v19 = vadd.f32 1e-18, %v219_v17 }
 0x18f   :  { %v228_v20 = vmul.f32 %v491_v18, %v225_v12  ;;  %vm234_vm0 = vweird.f32 %v491_v18 }
 0x190   :  { %492 = vrsqrt.f32 %v226_v19  ;;  %vm235_vm4 = vmor %vm233_vm1, %vm234_vm0  ;;  %vm243_vm5 = vweird.f32 %v226_v19 }
 0x191   :  { %v229_v21 = vmul.f32 %v491_v18, %v228_v20 }
 0x193   :  { %v230_v22 = vmul.f32 0.5, %v229_v21 }
 0x195   :  { %v231_v26 = vsub.f32 1.5, %v230_v22 }
 0x196   :  { %v493_v23 = vpop.eup %492 }
 0x197   :  { %v238_v25 = vmul.f32 %v493_v23, %v226_v19  ;;  %v232_v29 = vmul.f32 %v491_v18, %v231_v26  ;;  %vm244_vm2 = vweird.f32 %v493_v23 }
 0x198   :  { %vm245_vm6 = vmor %vm243_vm5, %vm244_vm2 }
 0x199   :  { %v239_v27 = vmul.f32 %v493_v23, %v238_v25  ;;  %v236_v32 = vsel %vm235_vm4, %v491_v18, %v232_v29 }
 0x19a   :  { %v247_v37 = vmul.f32 %v236_v32, %v223_v34 }
 0x19b   :  { %v240_v30 = vmul.f32 0.5, %v239_v27 }
 0x19d   :  { %v241_v31 = vsub.f32 1.5, %v240_v30 }
 0x19f   :  { %v242_v33 = vmul.f32 %v493_v23, %v241_v31 }
 0x1a1   :  { %v246_v36 = vsel %vm245_vm6, %v493_v23, %v242_v33 }
 0x1a2   :  { %v248_v38 = vmul.f32 %v246_v36, %v224_v35 }
 0x1a4   :  { %v249_v39 = vpack.c.bf16 %v248_v38, %v247_v37 }
 0x1a6   :  { %322 = vmatmul.bf16.vlgmr.msra.gmra.mxu2 %v249_v39 }
 0x229   :  { %v323_v40 = vpop.f32.mrf.mxu2 }
 0x231   :  { %v325_v41 = vpop.f32.mrf.mxu2 }
 0x232   :  { %v480_v42 = vpack.c.bf16 %v325_v41, %v323_v40 }
 0x234   :  { %481 = vst [vmem:[#allocation8] sm:$0xff] %v480_v42  }
 0x235   :  { %344 = dma.vmem_to_hbm [thread:$0]  %s337_s29, 128, %s339_s5, [#allocation4], %s600_s24, %s600_s24, %s601_s25  }
 0x236   :  { %594 = dma.done.wait [#allocation4], 128  }
 0x237   :  { %595 = vsyncadd [#allocation4], 4294967168 }
 0x238   :  { %349 = vsyncpa [#allocation3], 1 }
 0x239   :  { %350 = vsyncpa [#allocation6], 1 }
 0x23a   :  { %351 = vsyncpa [#allocation4], 1 }

</bundles_post_ra>
